<compile_context>
chip_gen: v7x
topology: tpu7x:2x2x1
jax: 0.10.0
libtpu: 0.0.40
codegen_flags: <defaults>
</compile_context>

<pallas_src>
import math
import jax
import jax.numpy as jnp
from jax.experimental import pallas as pl
from jax.experimental.pallas import tpu as pltpu


def _pos_enc_kernel(x_ref, w1_ref, b1_ref, w2_ref, b2_ref, pe_ref, o_ref):
    # x_ref:  (TS, B, D)  one sequence tile, full batch (contiguous DMA)
    # w1_ref: (D, Hp)     b1_ref: (1, Hp)   (VMEM-resident, Hp padded to 128k)
    # w2_ref: (Hp, E)     b2_ref: (1, E)    (sqrt(E) already folded in)
    # pe_ref: (TS, E) in seq mode, (1, E) in step mode
    # o_ref:  (TS, B, E)
    h = jnp.dot(x_ref[...], w1_ref[...], preferred_element_type=jnp.float32)
    h = jnp.maximum(h + b1_ref[...], 0.0)                                  # ReLU, f32
    e = jnp.dot(h.astype(w2_ref.dtype), w2_ref[...],
                preferred_element_type=jnp.float32) + b2_ref[...]
    pe = pe_ref[...].astype(jnp.float32)[:, None, :]                       # (TS|1, 1, E)
    o_ref[...] = (e + pe).astype(o_ref.dtype)


def make_sinusoidal_pe(max_len, embed_dim):
    # Assumes even embed_dim (same as the torch module's interleaved sin/cos).
    position = jnp.arange(max_len, dtype=jnp.float32)[:, None]             # (max_len, 1)
    div_term = jnp.exp(jnp.arange(0, embed_dim, 2, dtype=jnp.float32)
                       * -(math.log(10000.0) / embed_dim))                 # (E/2,)
    sin = jnp.sin(position * div_term)
    cos = jnp.cos(position * div_term)
    pe = jnp.stack([sin, cos], axis=-1).reshape(max_len, embed_dim)        # interleaved
    return pe                                                              # (max_len, E)


def _round_up(v, m):
    return ((v + m - 1) // m) * m


def _vmem_budget_bytes():
    """Per-chip VMEM budget used both for tile sizing and vmem_limit_bytes."""
    kind = ""
    try:
        kind = jax.devices()[0].device_kind.lower()
    except Exception:
        pass
    if "v7" in kind:
        return 48 * 1024 * 1024      # v7x: 64 MiB physical per TensorCore
    return 32 * 1024 * 1024          # v5e/v6e: 128 MiB physical; limit set explicitly


def _pick_seq_tile(S, B, D, E, Hp, stream_bytes, budget, weight_bufs):
    """Sequence-tile size from a VMEM budget; full batch processed per block."""
    # resident params: w1/w2 in stream dtype, biases in f32, weight_bufs copies each
    resident = weight_bufs * (stream_bytes * (D * Hp + Hp * E) + 4 * (Hp + E))
    # bytes per sequence row (full batch in the block)
    per_row = (2 * stream_bytes * B * D        # x block, double-buffered
               + 2 * 4 * B * E                 # out block (f32), double-buffered
               + 2 * stream_bytes * E          # pe block, double-buffered
               + 4 * B * Hp                    # f32 ReLU intermediate
               + 4 * B * E)                    # f32 pre-epilogue activation
    avail = budget - resident - (2 << 20)      # ~2 MiB slack for compiler scratch
    ts = max(8, avail // max(per_row, 1))
    ts = min(ts, 1024, S)                      # >=512 rows already ~85% of HBM roofline
    if ts >= S:
        if S < 16:
            return S                           # single full tile (block == full dim)
        # split so both v7x TensorCores get a sequence tile (negligible cost elsewhere)
        ts = _round_up(pl.cdiv(S, 2), 8)
    return max(8, (ts // 8) * 8)


def positional_encoding_forward(x, w1, b1, w2, b2, pe, embed_dim, step=None,
                                stream_dtype=jnp.bfloat16):
    """x: (seq_len, batch, src_dim) -> (seq_len, batch, embed_dim) float32."""
    S, B, D = x.shape
    H = w1.shape[1]
    E = embed_dim
    stream_bytes = jnp.dtype(stream_dtype).itemsize

    # One-time constant parameter transforms (outside the kernel):
    #   pad hid_dim to a multiple of 128 (lane-dense intermediate; exact no-op),
    #   fold sqrt(embed_dim) into linear2, cast streamed tensors to stream_dtype.
    Hp = _round_up(H, 128)
    scale = math.sqrt(E)
    w1p = jnp.pad(w1, ((0, 0), (0, Hp - H))).astype(stream_dtype)
    b1p = jnp.pad(b1.reshape(1, H), ((0, 0), (0, Hp - H))).astype(jnp.float32)
    w2p = (jnp.pad(w2, ((0, Hp - H), (0, 0))) * scale).astype(stream_dtype)
    b2p = (b2 * scale).reshape(1, E).astype(jnp.float32)
    xs = x.astype(stream_dtype)

    if step is None:
        pe_in = pe[:S].astype(stream_dtype)                                  # (S, E)
    else:
        pe_in = jax.lax.dynamic_slice_in_dim(pe, step, 1, axis=0).astype(stream_dtype)  # (1, E)

    budget = _vmem_budget_bytes()

    # Advisory cost estimate (memory-bound kernel) for the XLA scheduler.
    flops = 2 * S * B * (D * Hp + Hp * E)
    bytes_accessed = (stream_bytes * (S * B * D + pe_in.shape[0] * E + D * Hp + Hp * E)
                      + 4 * (S * B * E + Hp + E))
    cost = pl.CostEstimate(flops=flops, transcendentals=0,
                           bytes_accessed=bytes_accessed)

    def build_and_call(single_buffer_params):
        weight_bufs = 1 if single_buffer_params else 2
        ts = _pick_seq_tile(S, B, D, E, Hp, stream_bytes, budget, weight_bufs)
        const_kw = dict(pipeline_mode=pl.Buffered(1)) if single_buffer_params else {}

        if step is None:
            pe_spec = pl.BlockSpec((ts, E), lambda i: (i, 0))                # streams with seq tile
        else:
            pe_spec = pl.BlockSpec((1, E), lambda i: (0, 0), **const_kw)     # single resident row

        in_specs = [
            # x: tile sequence, full batch per block -> one contiguous DMA per step
            pl.BlockSpec((ts, B, D), lambda i: (i, 0, 0)),
            # weights / biases: constant index -> VMEM resident, single-buffered
            pl.BlockSpec((D, Hp), lambda i: (0, 0), **const_kw),
            pl.BlockSpec((1, Hp), lambda i: (0, 0), **const_kw),
            pl.BlockSpec((Hp, E), lambda i: (0, 0), **const_kw),
            pl.BlockSpec((1, E), lambda i: (0, 0), **const_kw),
            pe_spec,
        ]
        return pl.pallas_call(
            _pos_enc_kernel,
            out_shape=jax.ShapeDtypeStruct((S, B, E), jnp.float32),
            grid=(pl.cdiv(S, ts),),
            in_specs=in_specs,
            out_specs=pl.BlockSpec((ts, B, E), lambda i: (i, 0, 0)),
            compiler_params=pltpu.CompilerParams(
                dimension_semantics=("parallel",),
                vmem_limit_bytes=budget),
            cost_estimate=cost,
        )(xs, w1p, b1p, w2p, b2p, pe_in)

    try:
        return build_and_call(single_buffer_params=True)
    except Exception:
        # Fallback for jax builds without per-BlockSpec pipeline_mode support.
        return build_and_call(single_buffer_params=False)


if __name__ == "__main__":
    # Module hyperparameters (small, consistent with the __init__ signature).
    src_dim, embed_dim, hid_dim, max_len = 8, 16, 32, 100
    seq_len, batch = 8, 2

    key = jax.random.PRNGKey(0)
    k_x, k_w1, k_b1, k_w2, k_b2 = jax.random.split(key, 5)

    # Deterministic synthetic parameters (stored already transposed: (in, out)).
    x = jax.random.normal(k_x, (seq_len, batch, src_dim), dtype=jnp.float32)
    w1 = jax.random.normal(k_w1, (src_dim, hid_dim), dtype=jnp.float32) * 0.1
    b1 = jax.random.normal(k_b1, (hid_dim,), dtype=jnp.float32) * 0.1
    w2 = jax.random.normal(k_w2, (hid_dim, embed_dim), dtype=jnp.float32) * 0.1
    b2 = jax.random.normal(k_b2, (embed_dim,), dtype=jnp.float32) * 0.1
    pe = make_sinusoidal_pe(max_len, embed_dim)

    def ref_forward(dtype, step=None):
        # Pure-JAX reference with the same stream-dtype rounding as the kernel.
        scale = math.sqrt(embed_dim)
        xr = x.astype(dtype).astype(jnp.float32)
        w1r = w1.astype(dtype).astype(jnp.float32)
        w2r = (w2 * scale).astype(dtype).astype(jnp.float32)
        b2r = b2 * scale
        h = jnp.maximum(jnp.einsum("sbd,dh->sbh", xr, w1r) + b1, 0.0)
        h = h.astype(dtype).astype(jnp.float32)
        e = jnp.einsum("sbh,he->sbe", h, w2r) + b2r
        if step is None:
            per = pe[:seq_len].astype(dtype).astype(jnp.float32)[:, None, :]
        else:
            per = pe[step].astype(dtype).astype(jnp.float32)[None, None, :]
        return e + per

    # --- f32 streams: sequence (encode) path ---------------------------------
    out = jax.block_until_ready(positional_encoding_forward(
        x, w1, b1, w2, b2, pe, embed_dim, step=None, stream_dtype=jnp.float32))
    assert jnp.allclose(out, ref_forward(jnp.float32), atol=2e-3, rtol=2e-3), \
        "f32 seq-mode mismatch vs reference"

    # --- f32 streams: decode (step) path --------------------------------------
    step = 5
    out_step = jax.block_until_ready(positional_encoding_forward(
        x, w1, b1, w2, b2, pe, embed_dim, step=step, stream_dtype=jnp.float32))
    assert jnp.allclose(out_step, ref_forward(jnp.float32, step=step),
                        atol=2e-3, rtol=2e-3), "f32 step-mode mismatch vs reference"

    # --- bf16 streams (default, HBM-traffic-halving path) ---------------------
    out_bf = jax.block_until_ready(positional_encoding_forward(
        x, w1, b1, w2, b2, pe, embed_dim, step=None))
    assert jnp.allclose(out_bf, ref_forward(jnp.bfloat16), atol=3e-2, rtol=3e-2), \
        "bf16 seq-mode mismatch vs reference"

    print("KERNEL_OK")
</pallas_src>

<mosaic_0001>
module attributes {stable_mosaic.version = 11 : i64} {
  func.func @_pos_enc_kernel(%arg0: i32, %arg1: memref<8x2x8xf32, #tpu.memory_space<vmem>>, %arg2: memref<8x128xf32, #tpu.memory_space<vmem>>, %arg3: memref<1x128xf32, #tpu.memory_space<vmem>>, %arg4: memref<128x16xf32, #tpu.memory_space<vmem>>, %arg5: memref<1x16xf32, #tpu.memory_space<vmem>>, %arg6: memref<8x16xf32, #tpu.memory_space<vmem>>, %arg7: memref<8x2x16xf32, #tpu.memory_space<vmem>>) attributes {dimension_semantics = [#tpu.dimension_semantics<parallel>], iteration_bounds = array<i64: 1>, scalar_prefetch = 0 : i64, scratch_operands = 0 : i64, tpu.core_type = #tpu.core_type<tc>, window_params = [{transform_indices = @transform_0, window_bounds = array<i64: 8, 2, 8>}, {pipeline_mode = #tpu.pipeline_mode<synchronous>, transform_indices = @transform_1, window_bounds = array<i64: 8, 128>}, {pipeline_mode = #tpu.pipeline_mode<synchronous>, transform_indices = @transform_2, window_bounds = array<i64: 1, 128>}, {pipeline_mode = #tpu.pipeline_mode<synchronous>, transform_indices = @transform_3, window_bounds = array<i64: 128, 16>}, {pipeline_mode = #tpu.pipeline_mode<synchronous>, transform_indices = @transform_4, window_bounds = array<i64: 1, 16>}, {transform_indices = @transform_5, window_bounds = array<i64: 8, 16>}, {transform_indices = @transform_6, window_bounds = array<i64: 8, 2, 16>}]} {
    %c0 = arith.constant 0 : index
    %c0_0 = arith.constant 0 : index
    %c0_1 = arith.constant 0 : index
    %0 = vector.load %arg1[%c0, %c0_0, %c0_1] : memref<8x2x8xf32, #tpu.memory_space<vmem>>, vector<8x2x8xf32>
    %c0_2 = arith.constant 0 : index
    %c0_3 = arith.constant 0 : index
    %1 = vector.load %arg2[%c0_2, %c0_3] : memref<8x128xf32, #tpu.memory_space<vmem>>, vector<8x128xf32>
    %cst = arith.constant dense<0.000000e+00> : vector<8x2x128xf32>
    %2 = tpu.matmul %0, %1, %cst {dimension_numbers = #tpu.dot_dimension_numbers<[2], [0], [0, 1], [1], [0, 0, 0, 1, 1, 1], [], []>} : vector<8x2x8xf32>, vector<8x128xf32>, vector<8x2x128xf32> -> vector<8x2x128xf32>
    %c0_4 = arith.constant 0 : index
    %c0_5 = arith.constant 0 : index
    %3 = vector.load %arg3[%c0_4, %c0_5] : memref<1x128xf32, #tpu.memory_space<vmem>>, vector<1x128xf32>
    %4 = vector.shape_cast %3 : vector<1x128xf32> to vector<1x1x128xf32>
    %5 = vector.broadcast %4 : vector<1x1x128xf32> to vector<8x2x128xf32>
    %6 = arith.addf %2, %5 : vector<8x2x128xf32>
    %cst_6 = arith.constant 0.000000e+00 : f32
    %7 = vector.broadcast %cst_6 : f32 to vector<8x2x128xf32>
    %8 = arith.maximumf %6, %7 : vector<8x2x128xf32>
    %c0_7 = arith.constant 0 : index
    %c0_8 = arith.constant 0 : index
    %9 = vector.load %arg4[%c0_7, %c0_8] : memref<128x16xf32, #tpu.memory_space<vmem>>, vector<128x16xf32>
    %cst_9 = arith.constant dense<0.000000e+00> : vector<8x2x16xf32>
    %10 = tpu.matmul %8, %9, %cst_9 {dimension_numbers = #tpu.dot_dimension_numbers<[2], [0], [0, 1], [1], [0, 0, 0, 1, 1, 1], [], []>} : vector<8x2x128xf32>, vector<128x16xf32>, vector<8x2x16xf32> -> vector<8x2x16xf32>
    %c0_10 = arith.constant 0 : index
    %c0_11 = arith.constant 0 : index
    %11 = vector.load %arg5[%c0_10, %c0_11] : memref<1x16xf32, #tpu.memory_space<vmem>>, vector<1x16xf32>
    %12 = vector.shape_cast %11 : vector<1x16xf32> to vector<1x1x16xf32>
    %13 = vector.broadcast %12 : vector<1x1x16xf32> to vector<8x2x16xf32>
    %14 = arith.addf %10, %13 : vector<8x2x16xf32>
    %c0_12 = arith.constant 0 : index
    %c0_13 = arith.constant 0 : index
    %15 = vector.load %arg6[%c0_12, %c0_13] : memref<8x16xf32, #tpu.memory_space<vmem>>, vector<8x16xf32>
    %16 = vector.shape_cast %15 : vector<8x16xf32> to vector<8x1x16xf32>
    %17 = vector.broadcast %16 : vector<8x1x16xf32> to vector<8x2x16xf32>
    %18 = arith.addf %14, %17 : vector<8x2x16xf32>
    %c0_14 = arith.constant 0 : index
    %c0_15 = arith.constant 0 : index
    %c0_16 = arith.constant 0 : index
    %19 = vector.load %arg7[%c0_14, %c0_15, %c0_16] : memref<8x2x16xf32, #tpu.memory_space<vmem>>, vector<8x2x16xf32>
    tpu.vector_store %arg7[%c0_14, %c0_15, %c0_16], %18 {strides = array<i32>} : memref<8x2x16xf32, #tpu.memory_space<vmem>>, vector<8x2x16xf32>,
    return
  }
  func.func @transform_0(%arg0: i32) -> (i32, i32, i32) {
    %c0_i32 = arith.constant 0 : i32
    %c0_i32_0 = arith.constant 0 : i32
    %c0_i32_1 = arith.constant 0 : i32
    return %arg0, %c0_i32, %c0_i32_0 : i32, i32, i32
  }
  func.func @transform_1(%arg0: i32) -> (i32, i32) {
    %c0_i32 = arith.constant 0 : i32
    %c0_i32_0 = arith.constant 0 : i32
    %c0_i32_1 = arith.constant 0 : i32
    return %c0_i32, %c0_i32_0 : i32, i32
  }
  func.func @transform_2(%arg0: i32) -> (i32, i32) {
    %c0_i32 = arith.constant 0 : i32
    %c0_i32_0 = arith.constant 0 : i32
    %c0_i32_1 = arith.constant 0 : i32
    return %c0_i32, %c0_i32_0 : i32, i32
  }
  func.func @transform_3(%arg0: i32) -> (i32, i32) {
    %c0_i32 = arith.constant 0 : i32
    %c0_i32_0 = arith.constant 0 : i32
    %c0_i32_1 = arith.constant 0 : i32
    return %c0_i32, %c0_i32_0 : i32, i32
  }
  func.func @transform_4(%arg0: i32) -> (i32, i32) {
    %c0_i32 = arith.constant 0 : i32
    %c0_i32_0 = arith.constant 0 : i32
    %c0_i32_1 = arith.constant 0 : i32
    return %c0_i32, %c0_i32_0 : i32, i32
  }
  func.func @transform_5(%arg0: i32) -> (i32, i32) {
    %c0_i32 = arith.constant 0 : i32
    %c0_i32_0 = arith.constant 0 : i32
    return %arg0, %c0_i32 : i32, i32
  }
  func.func @transform_6(%arg0: i32) -> (i32, i32, i32) {
    %c0_i32 = arith.constant 0 : i32
    %c0_i32_0 = arith.constant 0 : i32
    %c0_i32_1 = arith.constant 0 : i32
    return %arg0, %c0_i32, %c0_i32_0 : i32, i32, i32
  }
}

module attributes {stable_mosaic.version = 11 : i64} {
  func.func @_pos_enc_kernel(%arg0: i32, %arg1: memref<8x2x8xf32, #tpu.memory_space<vmem>>, %arg2: memref<8x128xf32, #tpu.memory_space<vmem>>, %arg3: memref<1x128xf32, #tpu.memory_space<vmem>>, %arg4: memref<128x16xf32, #tpu.memory_space<vmem>>, %arg5: memref<1x16xf32, #tpu.memory_space<vmem>>, %arg6: memref<8x16xf32, #tpu.memory_space<vmem>>, %arg7: memref<8x2x16xf32, #tpu.memory_space<vmem>>) attributes {dimension_semantics = [#tpu.dimension_semantics<parallel>], iteration_bounds = array<i64: 1>, scalar_prefetch = 0 : i64, scratch_operands = 0 : i64, tpu.core_type = #tpu.core_type<tc>, window_params = [{transform_indices = @transform_0, window_bounds = array<i64: 8, 2, 8>}, {pipeline_mode = #tpu.pipeline_mode<synchronous>, transform_indices = @transform_1, window_bounds = array<i64: 8, 128>}, {pipeline_mode = #tpu.pipeline_mode<synchronous>, transform_indices = @transform_2, window_bounds = array<i64: 1, 128>}, {pipeline_mode = #tpu.pipeline_mode<synchronous>, transform_indices = @transform_3, window_bounds = array<i64: 128, 16>}, {pipeline_mode = #tpu.pipeline_mode<synchronous>, transform_indices = @transform_4, window_bounds = array<i64: 1, 16>}, {transform_indices = @transform_5, window_bounds = array<i64: 8, 16>}, {transform_indices = @transform_6, window_bounds = array<i64: 8, 2, 16>}]} {
    %c0 = arith.constant 0 : index
    %c0_0 = arith.constant 0 : index
    %c0_1 = arith.constant 0 : index
    %0 = vector.load %arg1[%c0, %c0_0, %c0_1] : memref<8x2x8xf32, #tpu.memory_space<vmem>>, vector<8x2x8xf32>
    %c0_2 = arith.constant 0 : index
    %c0_3 = arith.constant 0 : index
    %1 = vector.load %arg2[%c0_2, %c0_3] : memref<8x128xf32, #tpu.memory_space<vmem>>, vector<8x128xf32>
    %cst = arith.constant dense<0.000000e+00> : vector<8x2x128xf32>
    %2 = tpu.matmul %0, %1, %cst {dimension_numbers = #tpu.dot_dimension_numbers<[2], [0], [0, 1], [1], [0, 0, 0, 1, 1, 1], [], []>} : vector<8x2x8xf32>, vector<8x128xf32>, vector<8x2x128xf32> -> vector<8x2x128xf32>
    %c0_4 = arith.constant 0 : index
    %c0_5 = arith.constant 0 : index
    %3 = vector.load %arg3[%c0_4, %c0_5] : memref<1x128xf32, #tpu.memory_space<vmem>>, vector<1x128xf32>
    %4 = vector.shape_cast %3 : vector<1x128xf32> to vector<1x1x128xf32>
    %5 = vector.broadcast %4 : vector<1x1x128xf32> to vector<8x2x128xf32>
    %6 = arith.addf %2, %5 : vector<8x2x128xf32>
    %cst_6 = arith.constant 0.000000e+00 : f32
    %7 = vector.broadcast %cst_6 : f32 to vector<8x2x128xf32>
    %8 = arith.maximumf %6, %7 : vector<8x2x128xf32>
    %c0_7 = arith.constant 0 : index
    %c0_8 = arith.constant 0 : index
    %9 = vector.load %arg4[%c0_7, %c0_8] : memref<128x16xf32, #tpu.memory_space<vmem>>, vector<128x16xf32>
    %cst_9 = arith.constant dense<0.000000e+00> : vector<8x2x16xf32>
    %10 = tpu.matmul %8, %9, %cst_9 {dimension_numbers = #tpu.dot_dimension_numbers<[2], [0], [0, 1], [1], [0, 0, 0, 1, 1, 1], [], []>} : vector<8x2x128xf32>, vector<128x16xf32>, vector<8x2x16xf32> -> vector<8x2x16xf32>
    %c0_10 = arith.constant 0 : index
    %c0_11 = arith.constant 0 : index
    %11 = vector.load %arg5[%c0_10, %c0_11] : memref<1x16xf32, #tpu.memory_space<vmem>>, vector<1x16xf32>
    %12 = vector.shape_cast %11 : vector<1x16xf32> to vector<1x1x16xf32>
    %13 = vector.broadcast %12 : vector<1x1x16xf32> to vector<8x2x16xf32>
    %14 = arith.addf %10, %13 : vector<8x2x16xf32>
    %c0_12 = arith.constant 0 : index
    %c0_13 = arith.constant 0 : index
    %15 = vector.load %arg6[%c0_12, %c0_13] : memref<8x16xf32, #tpu.memory_space<vmem>>, vector<8x16xf32>
    %16 = vector.shape_cast %15 : vector<8x16xf32> to vector<8x1x16xf32>
    %17 = vector.broadcast %16 : vector<8x1x16xf32> to vector<8x2x16xf32>
    %18 = arith.addf %14, %17 : vector<8x2x16xf32>
    %c0_14 = arith.constant 0 : index
    %c0_15 = arith.constant 0 : index
    %c0_16 = arith.constant 0 : index
    %19 = vector.load %arg7[%c0_14, %c0_15, %c0_16] : memref<8x2x16xf32, #tpu.memory_space<vmem>>, vector<8x2x16xf32>
    tpu.vector_store %arg7[%c0_14, %c0_15, %c0_16], %18 {strides = array<i32>} : memref<8x2x16xf32, #tpu.memory_space<vmem>>, vector<8x2x16xf32>,
    return
  }
  func.func @transform_0(%arg0: i32) -> (i32, i32, i32) {
    %c0_i32 = arith.constant 0 : i32
    %c0_i32_0 = arith.constant 0 : i32
    %c0_i32_1 = arith.constant 0 : i32
    return %arg0, %c0_i32, %c0_i32_0 : i32, i32, i32
  }
  func.func @transform_1(%arg0: i32) -> (i32, i32) {
    %c0_i32 = arith.constant 0 : i32
    %c0_i32_0 = arith.constant 0 : i32
    %c0_i32_1 = arith.constant 0 : i32
    return %c0_i32, %c0_i32_0 : i32, i32
  }
  func.func @transform_2(%arg0: i32) -> (i32, i32) {
    %c0_i32 = arith.constant 0 : i32
    %c0_i32_0 = arith.constant 0 : i32
    %c0_i32_1 = arith.constant 0 : i32
    return %c0_i32, %c0_i32_0 : i32, i32
  }
  func.func @transform_3(%arg0: i32) -> (i32, i32) {
    %c0_i32 = arith.constant 0 : i32
    %c0_i32_0 = arith.constant 0 : i32
    %c0_i32_1 = arith.constant 0 : i32
    return %c0_i32, %c0_i32_0 : i32, i32
  }
  func.func @transform_4(%arg0: i32) -> (i32, i32) {
    %c0_i32 = arith.constant 0 : i32
    %c0_i32_0 = arith.constant 0 : i32
    %c0_i32_1 = arith.constant 0 : i32
    return %c0_i32, %c0_i32_0 : i32, i32
  }
  func.func @transform_5(%arg0: i32) -> (i32, i32) {
    %c0_i32 = arith.constant 0 : i32
    %c0_i32_0 = arith.constant 0 : i32
    return %arg0, %c0_i32 : i32, i32
  }
  func.func @transform_6(%arg0: i32) -> (i32, i32, i32) {
    %c0_i32 = arith.constant 0 : i32
    %c0_i32_0 = arith.constant 0 : i32
    %c0_i32_1 = arith.constant 0 : i32
    return %arg0, %c0_i32, %c0_i32_0 : i32, i32, i32
  }
}

</mosaic_0001>

<bundles_post_ra>
// kernel: tpu_custom_call.1
= control target key start
LH: loop header
LB: loop body
LE: loop exit
PB: predicated region body
PF: predicated region fallthrough
CT: control target
= control target key end

     0   :  { %v52_v3 = vlaneseq  ;;  %v669_v6 = vmov 1983009808   ;;  %s838_s0 = inlined_call_operand.vmem [shape: f32[8,2,8], index: 0, kind: input, shape index: {}]   ;;  %s839_s1 = inlined_call_operand.vmem [shape: f32[8,128], index: 1, kind: input, shape index: {}]   ;;  %s840_s2 = inlined_call_operand.vmem [shape: f32[1,128], index: 2, kind: input, shape index: {}]   ;;  %s841_s3 = inlined_call_operand.vmem [shape: f32[128,16], index: 3, kind: input, shape index: {}]   ;;  %s842_s4 = inlined_call_operand.vmem [shape: f32[1,16], index: 4, kind: input, shape index: {}]   ;;  %s843_s5 = inlined_call_operand.vmem [shape: f32[8,16], index: 5, kind: input, shape index: {}]   ;;  %s844_s6 = inlined_call_operand.hbm [shape: f32[8,2,16], index: 6, kind: output, shape index: {}]  }
   0x1   :  { %v32_v0 = vld [vmem:[%s839_s1] sm:$0xff]  ;;  %v50_v7 = vunpack.c.l.s4 %v669_v6  ;;  %v28_v9 = vld [vmem:[%s838_s0 + $0x8] sm:$0x3]  ;;  %v29_v10 = vld [vmem:[%s838_s0 + $0xa] sm:$0x3] }
   0x2   :  { %v24_v1 = vld [vmem:[%s838_s0] sm:$0x3]  ;;  %v25_v2 = vld [vmem:[%s838_s0 + $0x2] sm:$0x3]  ;;  %567 = vmatprep.subr.mxu0 %v32_v0  ;;  %v26_v4 = vld [vmem:[%s838_s0 + $0x4] sm:$0x3]  ;;  %v64_v18 = vcombine.low %v28_v9, %v29_v10 }
   0x3   :  { %v27_v5 = vld [vmem:[%s838_s0 + $0x6] sm:$0x3]  ;;  %568 = vmatpush3.msra.mxu0 %v32_v0  ;;  %v724_v8 = vshrl.u32 %v52_v3, 7  ;;  %v47_v12 = vcombine.low %v24_v1, %v25_v2  ;;  %v30_v14 = vld [vmem:[%s838_s0 + $0xc] sm:$0x3]  ;;  %v51_v17 = vunpack.c.0.s8 %v50_v7  ;;  %v225_v21 = vld [vmem:[%s841_s3 + $0x10] sm:$0xff] }
   0x4   :  { %v223_v11 = vld [vmem:[%s841_s3] sm:$0xff]  ;;  %v48_v13 = vcombine.low %v26_v4, %v27_v5  ;;  %v31_v15 = vld [vmem:[%s838_s0 + $0xe] sm:$0x3]  ;;  %v226_v22 = vld [vmem:[%s841_s3 + $0x18] sm:$0xff] }
   0x5   :  { %v224_v16 = vld [vmem:[%s841_s3 + $0x8] sm:$0xff]  ;;  %v65_v19 = vcombine.low %v30_v14, %v31_v15  ;;  %v227_v23 = vld [vmem:[%s841_s3 + $0x20] sm:$0xff]  ;;  %v611_v24 = vpack.c.bf16 %v226_v22, %v225_v21  ;;  %v757_v26 = vsub.s32 %v51_v17, %v724_v8 }
   0x6   :  { %v607_v20 = vpack.c.bf16 %v224_v16, %v223_v11  ;;  %v228_v25 = vld [vmem:[%s841_s3 + $0x28] sm:$0xff] }
   0x8   :  { %608 = vmatprep.subr.bf16.mxu1 %v607_v20 }
   0x9   :  { %11 = vsyncpa [#allocation3], 0  ;;  %610 = vmatpush3.bf16.msra.mxu1 %v607_v20  ;;  %v615_v27 = vpack.c.bf16 %v228_v25, %v227_v23  ;;  %v55_v28 = vrot.slane %v47_v12, %v757_v26  ;;  %v62_v29 = vrot.slane %v48_v13, %v757_v26  ;;  %v72_v30 = vrot.slane %v64_v18, %v757_v26  ;;  %v229_v32 = vld [vmem:[%s841_s3 + $0x30] sm:$0xff]  ;;  %v230_v33 = vld [vmem:[%s841_s3 + $0x38] sm:$0xff] }
   0xa   :  { %v79_v31 = vrot.slane %v65_v19, %v757_v26  ;;  %612 = vmatprep.subr.bf16.mxu1 %v611_v24  ;;  %vm91_vm0 = vcmask 64512   ;;  %v619_v36 = vpack.c.bf16 %v230_v33, %v229_v32  ;;  %v231_v37 = vld [vmem:[%s841_s3 + $0x40] sm:$0xff]  ;;  %v232_v38 = vld [vmem:[%s841_s3 + $0x48] sm:$0xff]  ;;  %v233_v40 = vld [vmem:[%s841_s3 + $0x50] sm:$0xff]  ;;  %v670_v22 = vmov 1966171168  }
   0xb   :  { %v63_v34 = vcombine.low %v55_v28, %v62_v29  ;;  %v623_v39 = vpack.c.bf16 %v232_v38, %v231_v37  ;;  %v234_v41 = vld [vmem:[%s841_s3 + $0x58] sm:$0xff]  ;;  %v235_v43 = vld [vmem:[%s841_s3 + $0x60] sm:$0xff]  ;;  %v236_v44 = vld [vmem:[%s841_s3 + $0x68] sm:$0xff]  ;;  %v422_v23 = vunpack.c.l.s4 %v670_v22  ;;  %vm517_vm1 = vcmask 123904  }
   0xc   :  { %v80_v35 = vcombine.low %v72_v30, %v79_v31  ;;  %v627_v42 = vpack.c.bf16 %v234_v41, %v233_v40  ;;  %v631_v45 = vpack.c.bf16 %v236_v44, %v235_v43  ;;  %v237_v46 = vld [vmem:[%s841_s3 + $0x70] sm:$0xff]  ;;  %v238_v47 = vld [vmem:[%s841_s3 + $0x78] sm:$0xff]  ;;  %v542_v49 = vld [vmem:[%s840_s2] ss:$0 sm:$0xff]  ;;  %v471_v40 = vsub.s32 0, %v724_v8 }
   0xd   :  { %614 = vmatpush3.bf16.msra.mxu1 %v611_v24  ;;  %569 = vmatprep.mubr.msk.f32.mxu0 %vm91_vm0, %v63_v34  ;;  %v635_v48 = vpack.c.bf16 %v238_v47, %v237_v46  ;;  %v81_v50 = vcombine.low %v542_v49, %v542_v49  ;;  %v423_v24 = vunpack.c.0.s8 %v422_v23  ;;  %v418_v25 = vld [vmem:[%s843_s5] sm:$0xff] }
   0xe   :  { %616 = vmatprep.subr.bf16.mxu1 %v615_v27  ;;  %570 = vmatmul.mubr.msk.f32.vlgmr.msra.gmra.mrb[0].mxu0 %vm91_vm0, %v80_v35  ;;  %v545_v29 = vld [vmem:[%s842_s4] ss:$0 sm:$0xff]  ;;  %s671_s4 = smov [#allocation2]  }
   0xf   :  { %v88_v51 = vrot.slane %v81_v50, %v757_v26  ;;  %v426_v28 = vsub.s32 %v423_v24, %v724_v8  ;;  %v289_v30 = vcombine.low %v545_v29, %v545_v29  ;;  %s531_s5 = sshll.u32 %s671_s4, 4  ;;  %s532_s5 = int_to_ptr.vmem [resolvable:$true] %s531_s5 }
  0x10   :  { %s645_s0 = scalar_lea.vmem %s532_s5, 256  ;;  %p650_p1 = scmp.lt.s32.totalorder %s532_s5, %s532_s5 }
  0x11   :  { %618 = vmatpush3.bf16.msra.mxu1 %v615_v27  ;;  %v89_v52 = vcombine.low %v88_v51, %v88_v51  ;;  %v420_v27 = vcombine.high %v418_v25, %v418_v25  ;;  %v427_v32 = vrot.slane %v418_v25, %v426_v28  ;;  %v296_v33 = vrot.slane %v289_v30, %v757_v26  ;;  %p646_p0 = scmp.ne.s32.totalorder %s532_s5, %s645_s0  ;;  %p651_p2 = scmp.lt.s32.totalorder %s645_s0, %s645_s0 }
  0x12   :  { %620 = vmatprep.subr.bf16.mxu1 %v619_v36 }
  0x13   :  { %v434_v31 = vrot.slane %v420_v27, %v426_v28  ;;  %v435_v35 = vcombine.high %v427_v32, %v427_v32  ;;  %v443_v37 = vrot.slane %v427_v32, %v426_v28  ;;  %v297_v38 = vcombine.low %v296_v33, %v296_v33  ;;  %p652_p3 = por %p651_p2, %p650_p1 }
  0x15   :  { %622 = vmatpush3.bf16.msra.mxu1 %v619_v36  ;;  %v436_v34 = vcombine.high %v434_v31, %v434_v31  ;;  %v450_v36 = vrot.slane %v434_v31, %v426_v28  ;;  %v457_v41 = vrot.slane %v435_v35, %v426_v28  ;;  %v465_v44 = vcombine.high %v443_v37, %v443_v37  ;;  %p653_p4 = pnand %p652_p3, %p646_p0 }
  0x16   :  { %624 = vmatprep.subr.bf16.mxu1 %v623_v39 }
  0x17   :  { %v488_v47 = vrot.slane %v450_v36, %v471_v40  ;;  %v467_v51 = vcombine.high %v457_v41, %v457_v41 }
  0x19   :  { %626 = vmatpush3.bf16.msra.mxu1 %v623_v39  ;;  %v464_v39 = vrot.slane %v436_v34, %v426_v28 }
  0x1a   :  { %628 = vmatprep.subr.bf16.mxu1 %v627_v42 }
  0x1b   :  { %v468_v46 = vcombine.high %v464_v39, %v464_v39  ;;  %v492_v49 = vrot.slane %v464_v39, %v471_v40 }
  0x1d   :  { %630 = vmatpush3.bf16.msra.mxu1 %v627_v42  ;;  %v466_v42 = vcombine.high %v450_v36, %v450_v36 }
  0x1e   :  { %632 = vmatprep.subr.bf16.mxu1 %v631_v45 }
  0x21   :  { %634 = vmatpush3.bf16.msra.mxu1 %v631_v45 }
  0x22   :  { %636 = vmatprep.subr.bf16.mxu1 %v635_v48 }
  0x25   :  { %638 = vmatpush3.bf16.msra.mxu1 %v635_v48 }
  0xe1   :  { %v571_v53 = vpop.f32.mrb[0].mxu0 }
  0xe2   :  { %v168_v54 = vadd.f32 %v571_v53, %v89_v52  ;;  %v162_v55 = vpop.f32.mrb[1].mxu0 }
  0xe3   :  { %v163_v56 = vadd.f32 %v162_v55, %v89_v52  ;;  %v472_v52 = vrot.slane %v443_v37, %v471_v40  ;;  %v496_v55 = vrot.slane %v466_v42, %v471_v40 }
  0xe4   :  { %v190_v57 = vcombine.high %v168_v54, %v168_v54  ;;  %v197_v58 = vrot.slane %v168_v54, %v757_v26 }
  0xe5   :  { %v173_v59 = vcombine.high %v163_v56, %v163_v56  ;;  %v180_v60 = vrot.slane %v163_v56, %v757_v26 }
  0xe6   :  { %v204_v61 = vrot.slane %v190_v57, %v757_v26  ;;  %v205_v62 = vcombine.high %v197_v58, %v197_v58  ;;  %v219_v6 = vmax.f32 %v197_v58, 0.0  ;;  %v476_v57 = vrot.slane %v457_v41, %v471_v40 }
  0xe7   :  { %v187_v63 = vrot.slane %v173_v59, %v757_v26  ;;  %v188_v0 = vcombine.high %v180_v60, %v180_v60  ;;  %v215_v3 = vmax.f32 %v180_v60, 0.0  ;;  %v480_v58 = vrot.slane %v465_v44, %v471_v40 }
  0xe8   :  { %v206_v1 = vcombine.high %v204_v61, %v204_v61  ;;  %v220_v2 = vmax.f32 %v205_v62, 0.0  ;;  %v221_v7 = vmax.f32 %v204_v61, 0.0  ;;  %v500_v61 = vrot.slane %v468_v46, %v471_v40 }
  0xe9   :  { %v216_v4 = vmax.f32 %v188_v0, 0.0  ;;  %v189_v5 = vcombine.high %v187_v63, %v187_v63  ;;  %v217_v10 = vmax.f32 %v187_v63, 0.0 }
  0xea   :  { %v222_v9 = vmax.f32 %v206_v1, 0.0  ;;  %v270_v13 = vcombine.low %v219_v6, %v220_v2  ;;  %v484_v1 = vrot.slane %v467_v51, %v471_v40 }
  0xeb   :  { %v218_v11 = vmax.f32 %v189_v5, 0.0  ;;  %v253_v12 = vcombine.low %v215_v3, %v216_v4 }
  0xec   :  { %v271_v14 = vcombine.low %v221_v7, %v222_v9  ;;  %v278_v19 = vrot.slane %v270_v13, %v757_v26 }
  0xed   :  { %v254_v15 = vcombine.low %v217_v10, %v218_v11  ;;  %v261_v17 = vrot.slane %v253_v12, %v757_v26 }
  0xee   :  { %v285_v16 = vrot.slane %v271_v14, %v757_v26 }
  0xef   :  { %v268_v18 = vrot.slane %v254_v15, %v757_v26 }
  0xf0   :  { %v286_v21 = vcombine.low %v278_v19, %v285_v16 }
  0xf1   :  { %v269_v20 = vcombine.low %v261_v17, %v268_v18 }
  0xf3   :  { %604 = vmatprep.mubr.f32.mxu1 %v269_v20 }
  0xf4   :  { %605 = vmatmul.mubr.f32.vlgmr.msra.gmra.mrb[0].mxu1 %v286_v21 }
 0x1c7   :  { %v606_v43 = vpop.f32.mrb[0].mxu1 }
 0x1c8   :  { %v371_v45 = vadd.f32 %v606_v43, %v297_v38  ;;  %v365_v48 = vpop.f32.mrb[1].mxu1 }
 0x1c9   :  { %v366_v50 = vadd.f32 %v365_v48, %v297_v38 }
 0x1ca   :  { %v393_v53 = vcombine.high %v371_v45, %v371_v45  ;;  %v400_v54 = vrot.slane %v371_v45, %v757_v26 }
 0x1cb   :  { %v376_v56 = vcombine.high %v366_v50, %v366_v50  ;;  %v383_v8 = vrot.slane %v366_v50, %v757_v26 }
 0x1cc   :  { %v407_v59 = vrot.slane %v393_v53, %v757_v26  ;;  %v408_v60 = vcombine.high %v400_v54, %v400_v54  ;;  %v513_v62 = vadd.f32 %v488_v47, %v400_v54 }
 0x1cd   :  { %v390_v63 = vrot.slane %v376_v56, %v757_v26  ;;  %v391_v0 = vcombine.high %v383_v8, %v383_v8  ;;  %v509_v2 = vadd.f32 %v472_v52, %v383_v8 }
 0x1ce   :  { %v409_v3 = vcombine.high %v407_v59, %v407_v59  ;;  %v514_v4 = vadd.f32 %v492_v49, %v408_v60  ;;  %v515_v5 = vadd.f32 %v496_v55, %v407_v59  ;;  %522 = vst.msk [vmem:[#allocation2 + $0x8] sm:$0x3] %vm517_vm1, %v513_v62 }
 0x1cf   :  { %v392_v6 = vcombine.high %v390_v63, %v390_v63  ;;  %v510_v7 = vadd.f32 %v476_v57, %v391_v0  ;;  %v511_v9 = vadd.f32 %v480_v58, %v390_v63  ;;  %518 = vst.msk [vmem:[#allocation2] sm:$0x3] %vm517_vm1, %v509_v2 }
 0x1d0   :  { %v516_v10 = vadd.f32 %v500_v61, %v409_v3  ;;  %523 = vst.msk [vmem:[#allocation2 + $0xa] sm:$0x3] %vm517_vm1, %v514_v4  ;;  %524 = vst.msk [vmem:[#allocation2 + $0xc] sm:$0x3] %vm517_vm1, %v515_v5 }
 0x1d1   :  { %v512_v26 = vadd.f32 %v484_v1, %v392_v6  ;;  %519 = vst.msk [vmem:[#allocation2 + $0x2] sm:$0x3] %vm517_vm1, %v510_v7  ;;  %520 = vst.msk [vmem:[#allocation2 + $0x4] sm:$0x3] %vm517_vm1, %v511_v9 }
 0x1d2   :  { %525 = vst.msk [vmem:[#allocation2 + $0xe] sm:$0x3] %vm517_vm1, %v516_v10 }
 0x1d3   :  { %521 = vst.msk [vmem:[#allocation2 + $0x6] sm:$0x3] %vm517_vm1, %v512_v26 }
 0x1d4   :  { %656 = shalt.err (!%p653_p4)
}
 0x1d5   :  { %s657_s26 = scalar_lea.hbm %s844_s6, 256 }
 0x1d6   :  { %p658_p5 = scmp.ne.s32.totalorder %s844_s6, %s657_s26  ;;  %p661_p6 = scmp.lt.u32.totalorder %s657_s26, %s844_s6 }
 0x1d8   :  { %p663_p7 = pnand %p661_p6, %p658_p5 }
 0x1da   :  { %666 = shalt.err (!%p663_p7)
}
 0x1db   :  { %s672_s1 = smov 32   ;;  %s673_s7 = smov 2  }
 0x1dc   :  { %537 = dma.vmem_to_hbm [thread:$0]  %s532_s5, 256, %s844_s6, [#allocation3], %s672_s1, %s672_s1, %s673_s7  }
 0x1dd   :  { %667 = dma.done.wait [#allocation3], 256  }
 0x1de   :  { %668 = vsyncadd [#allocation3], 4294967040 }
 0x1df   :  { %541 = vsyncpa [#allocation3], 1 }

// kernel: tpu_custom_call.1
= control target key start
LH: loop header
LB: loop body
LE: loop exit
PB: predicated region body
PF: predicated region fallthrough
CT: control target
= control target key end

     0   :  { %v52_v3 = vlaneseq  ;;  %v669_v6 = vmov 1983009808   ;;  %s838_s0 = inlined_call_operand.vmem [shape: f32[8,2,8], index: 0, kind: input, shape index: {}]   ;;  %s839_s1 = inlined_call_operand.vmem [shape: f32[8,128], index: 1, kind: input, shape index: {}]   ;;  %s840_s2 = inlined_call_operand.vmem [shape: f32[1,128], index: 2, kind: input, shape index: {}]   ;;  %s841_s3 = inlined_call_operand.vmem [shape: f32[128,16], index: 3, kind: input, shape index: {}]   ;;  %s842_s4 = inlined_call_operand.vmem [shape: f32[1,16], index: 4, kind: input, shape index: {}]   ;;  %s843_s5 = inlined_call_operand.vmem [shape: f32[8,16], index: 5, kind: input, shape index: {}]   ;;  %s844_s6 = inlined_call_operand.hbm [shape: f32[8,2,16], index: 6, kind: output, shape index: {}]  }
   0x1   :  { %v32_v0 = vld [vmem:[%s839_s1] sm:$0xff]  ;;  %v50_v7 = vunpack.c.l.s4 %v669_v6  ;;  %v28_v9 = vld [vmem:[%s838_s0 + $0x8] sm:$0x3]  ;;  %v29_v10 = vld [vmem:[%s838_s0 + $0xa] sm:$0x3] }
   0x2   :  { %v24_v1 = vld [vmem:[%s838_s0] sm:$0x3]  ;;  %v25_v2 = vld [vmem:[%s838_s0 + $0x2] sm:$0x3]  ;;  %567 = vmatprep.subr.mxu0 %v32_v0  ;;  %v26_v4 = vld [vmem:[%s838_s0 + $0x4] sm:$0x3]  ;;  %v64_v18 = vcombine.low %v28_v9, %v29_v10 }
   0x3   :  { %v27_v5 = vld [vmem:[%s838_s0 + $0x6] sm:$0x3]  ;;  %568 = vmatpush3.msra.mxu0 %v32_v0  ;;  %v724_v8 = vshrl.u32 %v52_v3, 7  ;;  %v47_v12 = vcombine.low %v24_v1, %v25_v2  ;;  %v30_v14 = vld [vmem:[%s838_s0 + $0xc] sm:$0x3]  ;;  %v51_v17 = vunpack.c.0.s8 %v50_v7  ;;  %v225_v21 = vld [vmem:[%s841_s3 + $0x10] sm:$0xff] }
   0x4   :  { %v223_v11 = vld [vmem:[%s841_s3] sm:$0xff]  ;;  %v48_v13 = vcombine.low %v26_v4, %v27_v5  ;;  %v31_v15 = vld [vmem:[%s838_s0 + $0xe] sm:$0x3]  ;;  %v226_v22 = vld [vmem:[%s841_s3 + $0x18] sm:$0xff] }
   0x5   :  { %v224_v16 = vld [vmem:[%s841_s3 + $0x8] sm:$0xff]  ;;  %v65_v19 = vcombine.low %v30_v14, %v31_v15  ;;  %v227_v23 = vld [vmem:[%s841_s3 + $0x20] sm:$0xff]  ;;  %v611_v24 = vpack.c.bf16 %v226_v22, %v225_v21  ;;  %v757_v26 = vsub.s32 %v51_v17, %v724_v8 }
   0x6   :  { %v607_v20 = vpack.c.bf16 %v224_v16, %v223_v11  ;;  %v228_v25 = vld [vmem:[%s841_s3 + $0x28] sm:$0xff] }
   0x8   :  { %608 = vmatprep.subr.bf16.mxu1 %v607_v20 }
   0x9   :  { %11 = vsyncpa [#allocation3], 0  ;;  %610 = vmatpush3.bf16.msra.mxu1 %v607_v20  ;;  %v615_v27 = vpack.c.bf16 %v228_v25, %v227_v23  ;;  %v55_v28 = vrot.slane %v47_v12, %v757_v26  ;;  %v62_v29 = vrot.slane %v48_v13, %v757_v26  ;;  %v72_v30 = vrot.slane %v64_v18, %v757_v26  ;;  %v229_v32 = vld [vmem:[%s841_s3 + $0x30] sm:$0xff]  ;;  %v230_v33 = vld [vmem:[%s841_s3 + $0x38] sm:$0xff] }
   0xa   :  { %v79_v31 = vrot.slane %v65_v19, %v757_v26  ;;  %612 = vmatprep.subr.bf16.mxu1 %v611_v24  ;;  %vm91_vm0 = vcmask 64512   ;;  %v619_v36 = vpack.c.bf16 %v230_v33, %v229_v32  ;;  %v231_v37 = vld [vmem:[%s841_s3 + $0x40] sm:$0xff]  ;;  %v232_v38 = vld [vmem:[%s841_s3 + $0x48] sm:$0xff]  ;;  %v233_v40 = vld [vmem:[%s841_s3 + $0x50] sm:$0xff]  ;;  %v670_v22 = vmov 1966171168  }
   0xb   :  { %v63_v34 = vcombine.low %v55_v28, %v62_v29  ;;  %v623_v39 = vpack.c.bf16 %v232_v38, %v231_v37  ;;  %v234_v41 = vld [vmem:[%s841_s3 + $0x58] sm:$0xff]  ;;  %v235_v43 = vld [vmem:[%s841_s3 + $0x60] sm:$0xff]  ;;  %v236_v44 = vld [vmem:[%s841_s3 + $0x68] sm:$0xff]  ;;  %v422_v23 = vunpack.c.l.s4 %v670_v22  ;;  %vm517_vm1 = vcmask 123904  }
   0xc   :  { %v80_v35 = vcombine.low %v72_v30, %v79_v31  ;;  %v627_v42 = vpack.c.bf16 %v234_v41, %v233_v40  ;;  %v631_v45 = vpack.c.bf16 %v236_v44, %v235_v43  ;;  %v237_v46 = vld [vmem:[%s841_s3 + $0x70] sm:$0xff]  ;;  %v238_v47 = vld [vmem:[%s841_s3 + $0x78] sm:$0xff]  ;;  %v542_v49 = vld [vmem:[%s840_s2] ss:$0 sm:$0xff]  ;;  %v471_v40 = vsub.s32 0, %v724_v8 }
   0xd   :  { %614 = vmatpush3.bf16.msra.mxu1 %v611_v24  ;;  %569 = vmatprep.mubr.msk.f32.mxu0 %vm91_vm0, %v63_v34  ;;  %v635_v48 = vpack.c.bf16 %v238_v47, %v237_v46  ;;  %v81_v50 = vcombine.low %v542_v49, %v542_v49  ;;  %v423_v24 = vunpack.c.0.s8 %v422_v23  ;;  %v418_v25 = vld [vmem:[%s843_s5] sm:$0xff] }
   0xe   :  { %616 = vmatprep.subr.bf16.mxu1 %v615_v27  ;;  %570 = vmatmul.mubr.msk.f32.vlgmr.msra.gmra.mrb[0].mxu0 %vm91_vm0, %v80_v35  ;;  %v545_v29 = vld [vmem:[%s842_s4] ss:$0 sm:$0xff]  ;;  %s671_s4 = smov [#allocation2]  }
   0xf   :  { %v88_v51 = vrot.slane %v81_v50, %v757_v26  ;;  %v426_v28 = vsub.s32 %v423_v24, %v724_v8  ;;  %v289_v30 = vcombine.low %v545_v29, %v545_v29  ;;  %s531_s5 = sshll.u32 %s671_s4, 4  ;;  %s532_s5 = int_to_ptr.vmem [resolvable:$true] %s531_s5 }
  0x10   :  { %s645_s0 = scalar_lea.vmem %s532_s5, 256  ;;  %p650_p1 = scmp.lt.s32.totalorder %s532_s5, %s532_s5 }
  0x11   :  { %618 = vmatpush3.bf16.msra.mxu1 %v615_v27  ;;  %v89_v52 = vcombine.low %v88_v51, %v88_v51  ;;  %v420_v27 = vcombine.high %v418_v25, %v418_v25  ;;  %v427_v32 = vrot.slane %v418_v25, %v426_v28  ;;  %v296_v33 = vrot.slane %v289_v30, %v757_v26  ;;  %p646_p0 = scmp.ne.s32.totalorder %s532_s5, %s645_s0  ;;  %p651_p2 = scmp.lt.s32.totalorder %s645_s0, %s645_s0 }
  0x12   :  { %620 = vmatprep.subr.bf16.mxu1 %v619_v36 }
  0x13   :  { %v434_v31 = vrot.slane %v420_v27, %v426_v28  ;;  %v435_v35 = vcombine.high %v427_v32, %v427_v32  ;;  %v443_v37 = vrot.slane %v427_v32, %v426_v28  ;;  %v297_v38 = vcombine.low %v296_v33, %v296_v33  ;;  %p652_p3 = por %p651_p2, %p650_p1 }
  0x15   :  { %622 = vmatpush3.bf16.msra.mxu1 %v619_v36  ;;  %v436_v34 = vcombine.high %v434_v31, %v434_v31  ;;  %v450_v36 = vrot.slane %v434_v31, %v426_v28  ;;  %v457_v41 = vrot.slane %v435_v35, %v426_v28  ;;  %v465_v44 = vcombine.high %v443_v37, %v443_v37  ;;  %p653_p4 = pnand %p652_p3, %p646_p0 }
  0x16   :  { %624 = vmatprep.subr.bf16.mxu1 %v623_v39 }
  0x17   :  { %v488_v47 = vrot.slane %v450_v36, %v471_v40  ;;  %v467_v51 = vcombine.high %v457_v41, %v457_v41 }
  0x19   :  { %626 = vmatpush3.bf16.msra.mxu1 %v623_v39  ;;  %v464_v39 = vrot.slane %v436_v34, %v426_v28 }
  0x1a   :  { %628 = vmatprep.subr.bf16.mxu1 %v627_v42 }
  0x1b   :  { %v468_v46 = vcombine.high %v464_v39, %v464_v39  ;;  %v492_v49 = vrot.slane %v464_v39, %v471_v40 }
  0x1d   :  { %630 = vmatpush3.bf16.msra.mxu1 %v627_v42  ;;  %v466_v42 = vcombine.high %v450_v36, %v450_v36 }
  0x1e   :  { %632 = vmatprep.subr.bf16.mxu1 %v631_v45 }
  0x21   :  { %634 = vmatpush3.bf16.msra.mxu1 %v631_v45 }
  0x22   :  { %636 = vmatprep.subr.bf16.mxu1 %v635_v48 }
  0x25   :  { %638 = vmatpush3.bf16.msra.mxu1 %v635_v48 }
  0xe1   :  { %v571_v53 = vpop.f32.mrb[0].mxu0 }
  0xe2   :  { %v168_v54 = vadd.f32 %v571_v53, %v89_v52  ;;  %v162_v55 = vpop.f32.mrb[1].mxu0 }
  0xe3   :  { %v163_v56 = vadd.f32 %v162_v55, %v89_v52  ;;  %v472_v52 = vrot.slane %v443_v37, %v471_v40  ;;  %v496_v55 = vrot.slane %v466_v42, %v471_v40 }
  0xe4   :  { %v190_v57 = vcombine.high %v168_v54, %v168_v54  ;;  %v197_v58 = vrot.slane %v168_v54, %v757_v26 }
  0xe5   :  { %v173_v59 = vcombine.high %v163_v56, %v163_v56  ;;  %v180_v60 = vrot.slane %v163_v56, %v757_v26 }
  0xe6   :  { %v204_v61 = vrot.slane %v190_v57, %v757_v26  ;;  %v205_v62 = vcombine.high %v197_v58, %v197_v58  ;;  %v219_v6 = vmax.f32 %v197_v58, 0.0  ;;  %v476_v57 = vrot.slane %v457_v41, %v471_v40 }
  0xe7   :  { %v187_v63 = vrot.slane %v173_v59, %v757_v26  ;;  %v188_v0 = vcombine.high %v180_v60, %v180_v60  ;;  %v215_v3 = vmax.f32 %v180_v60, 0.0  ;;  %v480_v58 = vrot.slane %v465_v44, %v471_v40 }
  0xe8   :  { %v206_v1 = vcombine.high %v204_v61, %v204_v61  ;;  %v220_v2 = vmax.f32 %v205_v62, 0.0  ;;  %v221_v7 = vmax.f32 %v204_v61, 0.0  ;;  %v500_v61 = vrot.slane %v468_v46, %v471_v40 }
  0xe9   :  { %v216_v4 = vmax.f32 %v188_v0, 0.0  ;;  %v189_v5 = vcombine.high %v187_v63, %v187_v63  ;;  %v217_v10 = vmax.f32 %v187_v63, 0.0 }
  0xea   :  { %v222_v9 = vmax.f32 %v206_v1, 0.0  ;;  %v270_v13 = vcombine.low %v219_v6, %v220_v2  ;;  %v484_v1 = vrot.slane %v467_v51, %v471_v40 }
  0xeb   :  { %v218_v11 = vmax.f32 %v189_v5, 0.0  ;;  %v253_v12 = vcombine.low %v215_v3, %v216_v4 }
  0xec   :  { %v271_v14 = vcombine.low %v221_v7, %v222_v9  ;;  %v278_v19 = vrot.slane %v270_v13, %v757_v26 }
  0xed   :  { %v254_v15 = vcombine.low %v217_v10, %v218_v11  ;;  %v261_v17 = vrot.slane %v253_v12, %v757_v26 }
  0xee   :  { %v285_v16 = vrot.slane %v271_v14, %v757_v26 }
  0xef   :  { %v268_v18 = vrot.slane %v254_v15, %v757_v26 }
  0xf0   :  { %v286_v21 = vcombine.low %v278_v19, %v285_v16 }
  0xf1   :  { %v269_v20 = vcombine.low %v261_v17, %v268_v18 }
  0xf3   :  { %604 = vmatprep.mubr.f32.mxu1 %v269_v20 }
  0xf4   :  { %605 = vmatmul.mubr.f32.vlgmr.msra.gmra.mrb[0].mxu1 %v286_v21 }
 0x1c7   :  { %v606_v43 = vpop.f32.mrb[0].mxu1 }
 0x1c8   :  { %v371_v45 = vadd.f32 %v606_v43, %v297_v38  ;;  %v365_v48 = vpop.f32.mrb[1].mxu1 }
 0x1c9   :  { %v366_v50 = vadd.f32 %v365_v48, %v297_v38 }
 0x1ca   :  { %v393_v53 = vcombine.high %v371_v45, %v371_v45  ;;  %v400_v54 = vrot.slane %v371_v45, %v757_v26 }
 0x1cb   :  { %v376_v56 = vcombine.high %v366_v50, %v366_v50  ;;  %v383_v8 = vrot.slane %v366_v50, %v757_v26 }
 0x1cc   :  { %v407_v59 = vrot.slane %v393_v53, %v757_v26  ;;  %v408_v60 = vcombine.high %v400_v54, %v400_v54  ;;  %v513_v62 = vadd.f32 %v488_v47, %v400_v54 }
 0x1cd   :  { %v390_v63 = vrot.slane %v376_v56, %v757_v26  ;;  %v391_v0 = vcombine.high %v383_v8, %v383_v8  ;;  %v509_v2 = vadd.f32 %v472_v52, %v383_v8 }
 0x1ce   :  { %v409_v3 = vcombine.high %v407_v59, %v407_v59  ;;  %v514_v4 = vadd.f32 %v492_v49, %v408_v60  ;;  %v515_v5 = vadd.f32 %v496_v55, %v407_v59  ;;  %522 = vst.msk [vmem:[#allocation2 + $0x8] sm:$0x3] %vm517_vm1, %v513_v62 }
 0x1cf   :  { %v392_v6 = vcombine.high %v390_v63, %v390_v63  ;;  %v510_v7 = vadd.f32 %v476_v57, %v391_v0  ;;  %v511_v9 = vadd.f32 %v480_v58, %v390_v63  ;;  %518 = vst.msk [vmem:[#allocation2] sm:$0x3] %vm517_vm1, %v509_v2 }
 0x1d0   :  { %v516_v10 = vadd.f32 %v500_v61, %v409_v3  ;;  %523 = vst.msk [vmem:[#allocation2 + $0xa] sm:$0x3] %vm517_vm1, %v514_v4  ;;  %524 = vst.msk [vmem:[#allocation2 + $0xc] sm:$0x3] %vm517_vm1, %v515_v5 }
 0x1d1   :  { %v512_v26 = vadd.f32 %v484_v1, %v392_v6  ;;  %519 = vst.msk [vmem:[#allocation2 + $0x2] sm:$0x3] %vm517_vm1, %v510_v7  ;;  %520 = vst.msk [vmem:[#allocation2 + $0x4] sm:$0x3] %vm517_vm1, %v511_v9 }
 0x1d2   :  { %525 = vst.msk [vmem:[#allocation2 + $0xe] sm:$0x3] %vm517_vm1, %v516_v10 }
 0x1d3   :  { %521 = vst.msk [vmem:[#allocation2 + $0x6] sm:$0x3] %vm517_vm1, %v512_v26 }
 0x1d4   :  { %656 = shalt.err (!%p653_p4)
}
 0x1d5   :  { %s657_s26 = scalar_lea.hbm %s844_s6, 256 }
 0x1d6   :  { %p658_p5 = scmp.ne.s32.totalorder %s844_s6, %s657_s26  ;;  %p661_p6 = scmp.lt.u32.totalorder %s657_s26, %s844_s6 }
 0x1d8   :  { %p663_p7 = pnand %p661_p6, %p658_p5 }
 0x1da   :  { %666 = shalt.err (!%p663_p7)
}
 0x1db   :  { %s672_s1 = smov 32   ;;  %s673_s7 = smov 2  }
 0x1dc   :  { %537 = dma.vmem_to_hbm [thread:$0]  %s532_s5, 256, %s844_s6, [#allocation3], %s672_s1, %s672_s1, %s673_s7  }
 0x1dd   :  { %667 = dma.done.wait [#allocation3], 256  }
 0x1de   :  { %668 = vsyncadd [#allocation3], 4294967040 }
 0x1df   :  { %541 = vsyncpa [#allocation3], 1 }

</bundles_post_ra>
